<compile_context>
chip_gen: v7x
topology: tpu7x:2x2x1
jax: 0.10.0
libtpu: 0.0.40
codegen_flags: <defaults>
</compile_context>

<pallas_src>
import jax
import jax.numpy as jnp
from jax.experimental import pallas as pl
from jax.experimental.pallas import tpu as pltpu

# --- small demo sizes consistent with the module's forward ---
B = 8        # batch_size (full sublane)
E = 32       # embedding_size
H = 32       # hidden_size
V = 16       # output_size (vocab)
T = 8        # number of fused decode steps (each step == one module.forward())

B_BLK = 8    # batch rows per grid block
SLAB = 128   # lane-dense output width: [logp(V) | h_new(H) | zero pad]
assert B % B_BLK == 0 and V + H <= SLAB


def decoder_rnn_kernel(
    ids_ref,                                   # SMEM (T, B) int32   (scalar prefetch)
    h0_ref,                                    # (B_BLK, H)  initial hidden, this batch block
    emb_ref,                                   # (V, E)      embedding table (VMEM resident)
    w_ih_ref,                                  # (3, E, H)   gate-major [r, z, n]
    w_hh_ref,                                  # (3, H, H)   gate-major [r, z, n]
    b_rzn_ref,                                 # (3, 1, H)   [b_ir+b_hr, b_iz+b_hz, b_in]
    b_hn_ref,                                  # (1, H)      b_hn (stays inside r*(...))
    w_out_ref,                                 # (H, V)
    b_out_ref,                                 # (1, V)
    slab_ref,                                  # out: (1, B_BLK, SLAB)
    h_scr,                                     # VMEM scratch (B_BLK, H): carried hidden
    emb_scr,                                   # VMEM scratch (B_BLK, E): gathered embeddings
):
    i = pl.program_id(0)                       # batch block  ("parallel")
    t = pl.program_id(1)                       # timestep     ("arbitrary", sequential)

    @pl.when(t == 0)
    def _():                                   # (re)initialize carried hidden per batch block
        h_scr[...] = h0_ref[...]

    # --- embedding gather: SMEM token ids index the VMEM-resident table ---
    for b in range(B_BLK):                     # static unroll, B_BLK == 8
        tok = ids_ref[t, i * B_BLK + b]
        emb_scr[pl.ds(b, 1), :] = emb_ref[pl.ds(tok, 1), :]

    # dropout is identity in the eval forward pass; relu matches F.relu(dropout(emb))
    x = jnp.maximum(emb_scr[...], 0.0)         # (B_BLK, E)
    h = h_scr[...]                             # (B_BLK, H)

    # --- GRU step, gate-major so each gate is lane-aligned at offset 0 ---
    i_r = jnp.dot(x, w_ih_ref[0], preferred_element_type=jnp.float32)
    i_z = jnp.dot(x, w_ih_ref[1], preferred_element_type=jnp.float32)
    i_n = jnp.dot(x, w_ih_ref[2], preferred_element_type=jnp.float32)
    h_r = jnp.dot(h, w_hh_ref[0], preferred_element_type=jnp.float32)
    h_z = jnp.dot(h, w_hh_ref[1], preferred_element_type=jnp.float32)
    h_n = jnp.dot(h, w_hh_ref[2], preferred_element_type=jnp.float32)

    r = jax.nn.sigmoid(i_r + h_r + b_rzn_ref[0])
    z = jax.nn.sigmoid(i_z + h_z + b_rzn_ref[1])
    n = jnp.tanh(i_n + b_rzn_ref[2] + r * (h_n + b_hn_ref[...]))
    h_new = (1.0 - z) * n + z * h              # (B_BLK, H)
    h_scr[...] = h_new                         # carry to next timestep

    # --- output projection + log_softmax(dim=1) ---
    o = jnp.dot(h_new, w_out_ref[...], preferred_element_type=jnp.float32) + b_out_ref[...]
    m = jnp.max(o, axis=1, keepdims=True)
    lse = jnp.log(jnp.sum(jnp.exp(o - m), axis=1, keepdims=True)) + m
    logp = o - lse                             # (B_BLK, V)

    # --- single lane-dense (B_BLK, 128) store: [logp | h_new | zero pad] ---
    pad = jnp.zeros((B_BLK, SLAB - V - H), jnp.float32)
    slab_ref[0] = jnp.concatenate([logp, h_new, pad], axis=1)


def decoder_rnn_forward(params, token_ids, hidden):
    """Fused T-step decode; each step is one DecoderRNNWithoutAttn.forward().

    token_ids: (T, B) int32 -- token fed at each step (e.g. teacher forcing)
    hidden:    (1, B, H)    -- initial GRU hidden state
    returns (log_probs (T, B, V), final hidden (1, B, H))
    """
    T_, B_ = token_ids.shape
    nb = B_ // B_BLK

    grid_spec = pltpu.PrefetchScalarGridSpec(
        num_scalar_prefetch=1,
        grid=(nb, T_),
        in_specs=[
            pl.BlockSpec((B_BLK, H), lambda i, t, ids: (i, 0)),       # h0 (per batch block)
            pl.BlockSpec((V, E),     lambda i, t, ids: (0, 0)),       # embedding table
            pl.BlockSpec((3, E, H),  lambda i, t, ids: (0, 0, 0)),    # w_ih (gate-major)
            pl.BlockSpec((3, H, H),  lambda i, t, ids: (0, 0, 0)),    # w_hh (gate-major)
            pl.BlockSpec((3, 1, H),  lambda i, t, ids: (0, 0, 0)),    # fused r/z biases + b_in
            pl.BlockSpec((1, H),     lambda i, t, ids: (0, 0)),       # b_hn
            pl.BlockSpec((H, V),     lambda i, t, ids: (0, 0)),       # w_out
            pl.BlockSpec((1, V),     lambda i, t, ids: (0, 0)),       # b_out
        ],
        out_specs=pl.BlockSpec((1, B_BLK, SLAB), lambda i, t, ids: (t, i, 0)),
        scratch_shapes=[
            pltpu.VMEM((B_BLK, H), jnp.float32),   # carried hidden
            pltpu.VMEM((B_BLK, E), jnp.float32),   # gathered embeddings
        ],
    )

    # Pre-fuse the r / z biases (legal); b_hn must stay inside r*(h_n + b_hn).
    b_rzn = jnp.stack([
        params["b_ih"][0] + params["b_hh"][0],     # r
        params["b_ih"][1] + params["b_hh"][1],     # z
        params["b_ih"][2],                         # n (input-side part)
    ])[:, None, :]                                 # (3, 1, H)
    b_hn = params["b_hh"][2][None, :]              # (1, H)

    slab = pl.pallas_call(
        decoder_rnn_kernel,
        grid_spec=grid_spec,
        out_shape=jax.ShapeDtypeStruct((T_, B_, SLAB), jnp.float32),
        compiler_params=pltpu.CompilerParams(
            dimension_semantics=("parallel", "arbitrary")),
    )(
        token_ids,                   # scalar prefetch -> SMEM
        hidden[0],
        params["embedding"],
        params["w_ih"], params["w_hh"],
        b_rzn, b_hn,
        params["w_out"], params["b_out"][None, :],
    )

    log_probs = slab[:, :, :V]                     # (T, B, V)
    h_final = slab[T_ - 1, :, V:V + H][None]       # (1, B, H)
    return log_probs, h_final


def decoder_rnn_reference(params, token_ids, hidden):
    """Pure-JAX reference: one DecoderRNNWithoutAttn.forward() per step."""
    h = hidden[0]
    outs = []
    for t in range(token_ids.shape[0]):
        x = jnp.maximum(params["embedding"][token_ids[t]], 0.0)
        r = jax.nn.sigmoid(x @ params["w_ih"][0] + params["b_ih"][0]
                           + h @ params["w_hh"][0] + params["b_hh"][0])
        z = jax.nn.sigmoid(x @ params["w_ih"][1] + params["b_ih"][1]
                           + h @ params["w_hh"][1] + params["b_hh"][1])
        n = jnp.tanh(x @ params["w_ih"][2] + params["b_ih"][2]
                     + r * (h @ params["w_hh"][2] + params["b_hh"][2]))
        h = (1.0 - z) * n + z * h
        o = h @ params["w_out"] + params["b_out"]
        outs.append(jax.nn.log_softmax(o, axis=1))
    return jnp.stack(outs), h[None]


def init_params(key):
    # Gate-major, (in_features, out_features) storage:
    #   w_ih[g] == torch W_ih_l0[g*H:(g+1)*H, :].T  with gate order g in (r, z, n),
    # so the kernel computes x @ W — identical math to PyTorch's x @ W.T.
    ks = jax.random.split(key, 8)
    s = 0.1
    return {
        "embedding": jax.random.normal(ks[0], (V, E), jnp.float32) * s,
        "w_ih":      jax.random.normal(ks[1], (3, E, H), jnp.float32) * s,
        "b_ih":      jax.random.normal(ks[2], (3, H), jnp.float32) * s,
        "w_hh":      jax.random.normal(ks[3], (3, H, H), jnp.float32) * s,
        "b_hh":      jax.random.normal(ks[4], (3, H), jnp.float32) * s,
        "w_out":     jax.random.normal(ks[5], (H, V), jnp.float32) * s,
        "b_out":     jax.random.normal(ks[6], (V,), jnp.float32) * s,
    }


if __name__ == "__main__":
    key = jax.random.PRNGKey(0)
    k_p, k_ids, k_h = jax.random.split(key, 3)

    params = init_params(k_p)
    token_ids = jax.random.randint(k_ids, (T, B), 0, V, dtype=jnp.int32)
    hidden0 = jax.random.normal(k_h, (1, B, H), jnp.float32)

    log_probs, h_final = decoder_rnn_forward(params, token_ids, hidden0)
    jax.block_until_ready((log_probs, h_final))

    assert log_probs.shape == (T, B, V)
    assert h_final.shape == (1, B, H)

    ref_logp, ref_h = decoder_rnn_reference(params, token_ids, hidden0)
    assert jnp.allclose(log_probs, ref_logp, atol=2e-2, rtol=2e-2), \
        float(jnp.max(jnp.abs(log_probs - ref_logp)))
    assert jnp.allclose(h_final, ref_h, atol=2e-2, rtol=2e-2), \
        float(jnp.max(jnp.abs(h_final - ref_h)))

    # TODO(synk): nn.Dropout / GRU inter-layer dropout are train-mode-only; forward
    # here matches eval semantics (identity), so no stochastic masking is emitted.
    print("KERNEL_OK")
</pallas_src>

<mosaic_0001>
module attributes {stable_mosaic.version = 11 : i64} {
  func.func @decoder_rnn_kernel(%arg0: i32, %arg1: i32, %arg2: memref<8x8xi32, #tpu.memory_space<smem>>, %arg3: memref<8x32xf32, #tpu.memory_space<vmem>>, %arg4: memref<16x32xf32, #tpu.memory_space<vmem>>, %arg5: memref<3x32x32xf32, #tpu.memory_space<vmem>>, %arg6: memref<3x32x32xf32, #tpu.memory_space<vmem>>, %arg7: memref<3x1x32xf32, #tpu.memory_space<vmem>>, %arg8: memref<1x32xf32, #tpu.memory_space<vmem>>, %arg9: memref<32x16xf32, #tpu.memory_space<vmem>>, %arg10: memref<1x16xf32, #tpu.memory_space<vmem>>, %arg11: memref<1x8x128xf32, #tpu.memory_space<vmem>>, %arg12: memref<8x32xf32, #tpu.memory_space<vmem>>, %arg13: memref<8x32xf32, #tpu.memory_space<vmem>>) attributes {dimension_semantics = [#tpu.dimension_semantics<parallel>, #tpu.dimension_semantics<arbitrary>], iteration_bounds = array<i64: 1, 8>, scalar_prefetch = 1 : i64, scratch_operands = 2 : i64, tpu.core_type = #tpu.core_type<tc>, window_params = [{transform_indices = @transform_0, window_bounds = array<i64: 8, 32>}, {pipeline_mode = #tpu.pipeline_mode<synchronous>, transform_indices = @transform_1, window_bounds = array<i64: 16, 32>}, {pipeline_mode = #tpu.pipeline_mode<synchronous>, transform_indices = @transform_2, window_bounds = array<i64: 3, 32, 32>}, {pipeline_mode = #tpu.pipeline_mode<synchronous>, transform_indices = @transform_3, window_bounds = array<i64: 3, 32, 32>}, {pipeline_mode = #tpu.pipeline_mode<synchronous>, transform_indices = @transform_4, window_bounds = array<i64: 3, 1, 32>}, {pipeline_mode = #tpu.pipeline_mode<synchronous>, transform_indices = @transform_5, window_bounds = array<i64: 1, 32>}, {pipeline_mode = #tpu.pipeline_mode<synchronous>, transform_indices = @transform_6, window_bounds = array<i64: 32, 16>}, {pipeline_mode = #tpu.pipeline_mode<synchronous>, transform_indices = @transform_7, window_bounds = array<i64: 1, 16>}, {transform_indices = @transform_8, window_bounds = array<i64: 1, 8, 128>}]} {
    %c0_i32 = arith.constant 0 : i32
    %0 = arith.cmpi eq, %arg1, %c0_i32 : i32
    %1 = arith.extui %0 : i1 to i32
    %c0_i32_0 = arith.constant 0 : i32
    %2 = arith.cmpi ne, %1, %c0_i32_0 : i32
    scf.if %2 {
      %c0_80 = arith.constant 0 : index
      %c0_81 = arith.constant 0 : index
      %146 = vector.load %arg3[%c0_80, %c0_81] : memref<8x32xf32, #tpu.memory_space<vmem>>, vector<8x32xf32>
      %c0_82 = arith.constant 0 : index
      %c0_83 = arith.constant 0 : index
      %147 = vector.load %arg12[%c0_82, %c0_83] : memref<8x32xf32, #tpu.memory_space<vmem>>, vector<8x32xf32>
      tpu.vector_store %arg12[%c0_82, %c0_83], %146 {strides = array<i32>} : memref<8x32xf32, #tpu.memory_space<vmem>>, vector<8x32xf32>,
    } else {
    }
    %c8_i32 = arith.constant 8 : i32
    %3 = arith.muli %arg0, %c8_i32 : i32
    %c0_i32_1 = arith.constant 0 : i32
    %4 = arith.addi %3, %c0_i32_1 : i32
    %5 = arith.index_cast %arg1 : i32 to index
    %6 = arith.index_cast %4 : i32 to index
    %7 = memref.load %arg2[%5, %6] : memref<8x8xi32, #tpu.memory_space<smem>>
    %8 = arith.index_cast %7 : i32 to index
    %c0 = arith.constant 0 : index
    %9 = vector.load %arg4[%8, %c0] : memref<16x32xf32, #tpu.memory_space<vmem>>, vector<1x32xf32>
    %c0_2 = arith.constant 0 : index
    %c0_3 = arith.constant 0 : index
    %10 = vector.load %arg13[%c0_2, %c0_3] : memref<8x32xf32, #tpu.memory_space<vmem>>, vector<1x32xf32>
    tpu.vector_store %arg13[%c0_2, %c0_3], %9 {strides = array<i32>} : memref<8x32xf32, #tpu.memory_space<vmem>>, vector<1x32xf32>,
    %c8_i32_4 = arith.constant 8 : i32
    %11 = arith.muli %arg0, %c8_i32_4 : i32
    %c1_i32 = arith.constant 1 : i32
    %12 = arith.addi %11, %c1_i32 : i32
    %13 = arith.index_cast %arg1 : i32 to index
    %14 = arith.index_cast %12 : i32 to index
    %15 = memref.load %arg2[%13, %14] : memref<8x8xi32, #tpu.memory_space<smem>>
    %16 = arith.index_cast %15 : i32 to index
    %c0_5 = arith.constant 0 : index
    %17 = vector.load %arg4[%16, %c0_5] : memref<16x32xf32, #tpu.memory_space<vmem>>, vector<1x32xf32>
    %c1 = arith.constant 1 : index
    %c0_6 = arith.constant 0 : index
    %18 = vector.load %arg13[%c1, %c0_6] : memref<8x32xf32, #tpu.memory_space<vmem>>, vector<1x32xf32>
    tpu.vector_store %arg13[%c1, %c0_6], %17 {strides = array<i32>} : memref<8x32xf32, #tpu.memory_space<vmem>>, vector<1x32xf32>,
    %c8_i32_7 = arith.constant 8 : i32
    %19 = arith.muli %arg0, %c8_i32_7 : i32
    %c2_i32 = arith.constant 2 : i32
    %20 = arith.addi %19, %c2_i32 : i32
    %21 = arith.index_cast %arg1 : i32 to index
    %22 = arith.index_cast %20 : i32 to index
    %23 = memref.load %arg2[%21, %22] : memref<8x8xi32, #tpu.memory_space<smem>>
    %24 = arith.index_cast %23 : i32 to index
    %c0_8 = arith.constant 0 : index
    %25 = vector.load %arg4[%24, %c0_8] : memref<16x32xf32, #tpu.memory_space<vmem>>, vector<1x32xf32>
    %c2 = arith.constant 2 : index
    %c0_9 = arith.constant 0 : index
    %26 = vector.load %arg13[%c2, %c0_9] : memref<8x32xf32, #tpu.memory_space<vmem>>, vector<1x32xf32>
    tpu.vector_store %arg13[%c2, %c0_9], %25 {strides = array<i32>} : memref<8x32xf32, #tpu.memory_space<vmem>>, vector<1x32xf32>,
    %c8_i32_10 = arith.constant 8 : i32
    %27 = arith.muli %arg0, %c8_i32_10 : i32
    %c3_i32 = arith.constant 3 : i32
    %28 = arith.addi %27, %c3_i32 : i32
    %29 = arith.index_cast %arg1 : i32 to index
    %30 = arith.index_cast %28 : i32 to index
    %31 = memref.load %arg2[%29, %30] : memref<8x8xi32, #tpu.memory_space<smem>>
    %32 = arith.index_cast %31 : i32 to index
    %c0_11 = arith.constant 0 : index
    %33 = vector.load %arg4[%32, %c0_11] : memref<16x32xf32, #tpu.memory_space<vmem>>, vector<1x32xf32>
    %c3 = arith.constant 3 : index
    %c0_12 = arith.constant 0 : index
    %34 = vector.load %arg13[%c3, %c0_12] : memref<8x32xf32, #tpu.memory_space<vmem>>, vector<1x32xf32>
    tpu.vector_store %arg13[%c3, %c0_12], %33 {strides = array<i32>} : memref<8x32xf32, #tpu.memory_space<vmem>>, vector<1x32xf32>,
    %c8_i32_13 = arith.constant 8 : i32
    %35 = arith.muli %arg0, %c8_i32_13 : i32
    %c4_i32 = arith.constant 4 : i32
    %36 = arith.addi %35, %c4_i32 : i32
    %37 = arith.index_cast %arg1 : i32 to index
    %38 = arith.index_cast %36 : i32 to index
    %39 = memref.load %arg2[%37, %38] : memref<8x8xi32, #tpu.memory_space<smem>>
    %40 = arith.index_cast %39 : i32 to index
    %c0_14 = arith.constant 0 : index
    %41 = vector.load %arg4[%40, %c0_14] : memref<16x32xf32, #tpu.memory_space<vmem>>, vector<1x32xf32>
    %c4 = arith.constant 4 : index
    %c0_15 = arith.constant 0 : index
    %42 = vector.load %arg13[%c4, %c0_15] : memref<8x32xf32, #tpu.memory_space<vmem>>, vector<1x32xf32>
    tpu.vector_store %arg13[%c4, %c0_15], %41 {strides = array<i32>} : memref<8x32xf32, #tpu.memory_space<vmem>>, vector<1x32xf32>,
    %c8_i32_16 = arith.constant 8 : i32
    %43 = arith.muli %arg0, %c8_i32_16 : i32
    %c5_i32 = arith.constant 5 : i32
    %44 = arith.addi %43, %c5_i32 : i32
    %45 = arith.index_cast %arg1 : i32 to index
    %46 = arith.index_cast %44 : i32 to index
    %47 = memref.load %arg2[%45, %46] : memref<8x8xi32, #tpu.memory_space<smem>>
    %48 = arith.index_cast %47 : i32 to index
    %c0_17 = arith.constant 0 : index
    %49 = vector.load %arg4[%48, %c0_17] : memref<16x32xf32, #tpu.memory_space<vmem>>, vector<1x32xf32>
    %c5 = arith.constant 5 : index
    %c0_18 = arith.constant 0 : index
    %50 = vector.load %arg13[%c5, %c0_18] : memref<8x32xf32, #tpu.memory_space<vmem>>, vector<1x32xf32>
    tpu.vector_store %arg13[%c5, %c0_18], %49 {strides = array<i32>} : memref<8x32xf32, #tpu.memory_space<vmem>>, vector<1x32xf32>,
    %c8_i32_19 = arith.constant 8 : i32
    %51 = arith.muli %arg0, %c8_i32_19 : i32
    %c6_i32 = arith.constant 6 : i32
    %52 = arith.addi %51, %c6_i32 : i32
    %53 = arith.index_cast %arg1 : i32 to index
    %54 = arith.index_cast %52 : i32 to index
    %55 = memref.load %arg2[%53, %54] : memref<8x8xi32, #tpu.memory_space<smem>>
    %56 = arith.index_cast %55 : i32 to index
    %c0_20 = arith.constant 0 : index
    %57 = vector.load %arg4[%56, %c0_20] : memref<16x32xf32, #tpu.memory_space<vmem>>, vector<1x32xf32>
    %c6 = arith.constant 6 : index
    %c0_21 = arith.constant 0 : index
    %58 = vector.load %arg13[%c6, %c0_21] : memref<8x32xf32, #tpu.memory_space<vmem>>, vector<1x32xf32>
    tpu.vector_store %arg13[%c6, %c0_21], %57 {strides = array<i32>} : memref<8x32xf32, #tpu.memory_space<vmem>>, vector<1x32xf32>,
    %c8_i32_22 = arith.constant 8 : i32
    %59 = arith.muli %arg0, %c8_i32_22 : i32
    %c7_i32 = arith.constant 7 : i32
    %60 = arith.addi %59, %c7_i32 : i32
    %61 = arith.index_cast %arg1 : i32 to index
    %62 = arith.index_cast %60 : i32 to index
    %63 = memref.load %arg2[%61, %62] : memref<8x8xi32, #tpu.memory_space<smem>>
    %64 = arith.index_cast %63 : i32 to index
    %c0_23 = arith.constant 0 : index
    %65 = vector.load %arg4[%64, %c0_23] : memref<16x32xf32, #tpu.memory_space<vmem>>, vector<1x32xf32>
    %c7 = arith.constant 7 : index
    %c0_24 = arith.constant 0 : index
    %66 = vector.load %arg13[%c7, %c0_24] : memref<8x32xf32, #tpu.memory_space<vmem>>, vector<1x32xf32>
    tpu.vector_store %arg13[%c7, %c0_24], %65 {strides = array<i32>} : memref<8x32xf32, #tpu.memory_space<vmem>>, vector<1x32xf32>,
    %c0_25 = arith.constant 0 : index
    %c0_26 = arith.constant 0 : index
    %67 = vector.load %arg13[%c0_25, %c0_26] : memref<8x32xf32, #tpu.memory_space<vmem>>, vector<8x32xf32>
    %cst = arith.constant 0.000000e+00 : f32
    %68 = vector.broadcast %cst : f32 to vector<8x32xf32>
    %69 = arith.maximumf %67, %68 : vector<8x32xf32>
    %c0_27 = arith.constant 0 : index
    %c0_28 = arith.constant 0 : index
    %70 = vector.load %arg12[%c0_27, %c0_28] : memref<8x32xf32, #tpu.memory_space<vmem>>, vector<8x32xf32>
    %c0_29 = arith.constant 0 : index
    %c0_30 = arith.constant 0 : index
    %c0_31 = arith.constant 0 : index
    %71 = vector.load %arg5[%c0_29, %c0_30, %c0_31] : memref<3x32x32xf32, #tpu.memory_space<vmem>>, vector<1x32x32xf32>
    %72 = vector.shape_cast %71 : vector<1x32x32xf32> to vector<32x32xf32>
    %cst_32 = arith.constant dense<0.000000e+00> : vector<8x32xf32>
    %73 = tpu.matmul %69, %72, %cst_32 {dimension_numbers = #tpu.dot_dimension_numbers<[1], [0], [0], [1], [0, 0, 1, 1], [], []>} : vector<8x32xf32>, vector<32x32xf32>, vector<8x32xf32> -> vector<8x32xf32>
    %c1_33 = arith.constant 1 : index
    %c0_34 = arith.constant 0 : index
    %c0_35 = arith.constant 0 : index
    %74 = vector.load %arg5[%c1_33, %c0_34, %c0_35] : memref<3x32x32xf32, #tpu.memory_space<vmem>>, vector<1x32x32xf32>
    %75 = vector.shape_cast %74 : vector<1x32x32xf32> to vector<32x32xf32>
    %cst_36 = arith.constant dense<0.000000e+00> : vector<8x32xf32>
    %76 = tpu.matmul %69, %75, %cst_36 {dimension_numbers = #tpu.dot_dimension_numbers<[1], [0], [0], [1], [0, 0, 1, 1], [], []>} : vector<8x32xf32>, vector<32x32xf32>, vector<8x32xf32> -> vector<8x32xf32>
    %c2_37 = arith.constant 2 : index
    %c0_38 = arith.constant 0 : index
    %c0_39 = arith.constant 0 : index
    %77 = vector.load %arg5[%c2_37, %c0_38, %c0_39] : memref<3x32x32xf32, #tpu.memory_space<vmem>>, vector<1x32x32xf32>
    %78 = vector.shape_cast %77 : vector<1x32x32xf32> to vector<32x32xf32>
    %cst_40 = arith.constant dense<0.000000e+00> : vector<8x32xf32>
    %79 = tpu.matmul %69, %78, %cst_40 {dimension_numbers = #tpu.dot_dimension_numbers<[1], [0], [0], [1], [0, 0, 1, 1], [], []>} : vector<8x32xf32>, vector<32x32xf32>, vector<8x32xf32> -> vector<8x32xf32>
    %c0_41 = arith.constant 0 : index
    %c0_42 = arith.constant 0 : index
    %c0_43 = arith.constant 0 : index
    %80 = vector.load %arg6[%c0_41, %c0_42, %c0_43] : memref<3x32x32xf32, #tpu.memory_space<vmem>>, vector<1x32x32xf32>
    %81 = vector.shape_cast %80 : vector<1x32x32xf32> to vector<32x32xf32>
    %cst_44 = arith.constant dense<0.000000e+00> : vector<8x32xf32>
    %82 = tpu.matmul %70, %81, %cst_44 {dimension_numbers = #tpu.dot_dimension_numbers<[1], [0], [0], [1], [0, 0, 1, 1], [], []>} : vector<8x32xf32>, vector<32x32xf32>, vector<8x32xf32> -> vector<8x32xf32>
    %c1_45 = arith.constant 1 : index
    %c0_46 = arith.constant 0 : index
    %c0_47 = arith.constant 0 : index
    %83 = vector.load %arg6[%c1_45, %c0_46, %c0_47] : memref<3x32x32xf32, #tpu.memory_space<vmem>>, vector<1x32x32xf32>
    %84 = vector.shape_cast %83 : vector<1x32x32xf32> to vector<32x32xf32>
    %cst_48 = arith.constant dense<0.000000e+00> : vector<8x32xf32>
    %85 = tpu.matmul %70, %84, %cst_48 {dimension_numbers = #tpu.dot_dimension_numbers<[1], [0], [0], [1], [0, 0, 1, 1], [], []>} : vector<8x32xf32>, vector<32x32xf32>, vector<8x32xf32> -> vector<8x32xf32>
    %c2_49 = arith.constant 2 : index
    %c0_50 = arith.constant 0 : index
    %c0_51 = arith.constant 0 : index
    %86 = vector.load %arg6[%c2_49, %c0_50, %c0_51] : memref<3x32x32xf32, #tpu.memory_space<vmem>>, vector<1x32x32xf32>
    %87 = vector.shape_cast %86 : vector<1x32x32xf32> to vector<32x32xf32>
    %cst_52 = arith.constant dense<0.000000e+00> : vector<8x32xf32>
    %88 = tpu.matmul %70, %87, %cst_52 {dimension_numbers = #tpu.dot_dimension_numbers<[1], [0], [0], [1], [0, 0, 1, 1], [], []>} : vector<8x32xf32>, vector<32x32xf32>, vector<8x32xf32> -> vector<8x32xf32>
    %89 = arith.addf %73, %82 : vector<8x32xf32>
    %c0_53 = arith.constant 0 : index
    %c0_54 = arith.constant 0 : index
    %c0_55 = arith.constant 0 : index
    %90 = vector.load %arg7[%c0_53, %c0_54, %c0_55] : memref<3x1x32xf32, #tpu.memory_space<vmem>>, vector<1x1x32xf32>
    %91 = vector.shape_cast %90 : vector<1x1x32xf32> to vector<1x32xf32>
    %92 = vector.broadcast %91 : vector<1x32xf32> to vector<8x32xf32>
    %93 = arith.addf %89, %92 : vector<8x32xf32>
    %94 = arith.negf %93 : vector<8x32xf32>
    %95 = math.exp %94 : vector<8x32xf32>
    %cst_56 = arith.constant 1.000000e+00 : f32
    %96 = vector.broadcast %cst_56 : f32 to vector<8x32xf32>
    %97 = arith.addf %96, %95 : vector<8x32xf32>
    %98 = arith.divf %96, %97 : vector<8x32xf32>
    %99 = arith.addf %76, %85 : vector<8x32xf32>
    %c1_57 = arith.constant 1 : index
    %c0_58 = arith.constant 0 : index
    %c0_59 = arith.constant 0 : index
    %100 = vector.load %arg7[%c1_57, %c0_58, %c0_59] : memref<3x1x32xf32, #tpu.memory_space<vmem>>, vector<1x1x32xf32>
    %101 = vector.shape_cast %100 : vector<1x1x32xf32> to vector<1x32xf32>
    %102 = vector.broadcast %101 : vector<1x32xf32> to vector<8x32xf32>
    %103 = arith.addf %99, %102 : vector<8x32xf32>
    %104 = arith.negf %103 : vector<8x32xf32>
    %105 = math.exp %104 : vector<8x32xf32>
    %cst_60 = arith.constant 1.000000e+00 : f32
    %106 = vector.broadcast %cst_60 : f32 to vector<8x32xf32>
    %107 = arith.addf %106, %105 : vector<8x32xf32>
    %108 = arith.divf %106, %107 : vector<8x32xf32>
    %c2_61 = arith.constant 2 : index
    %c0_62 = arith.constant 0 : index
    %c0_63 = arith.constant 0 : index
    %109 = vector.load %arg7[%c2_61, %c0_62, %c0_63] : memref<3x1x32xf32, #tpu.memory_space<vmem>>, vector<1x1x32xf32>
    %110 = vector.shape_cast %109 : vector<1x1x32xf32> to vector<1x32xf32>
    %111 = vector.broadcast %110 : vector<1x32xf32> to vector<8x32xf32>
    %112 = arith.addf %79, %111 : vector<8x32xf32>
    %c0_64 = arith.constant 0 : index
    %c0_65 = arith.constant 0 : index
    %113 = vector.load %arg8[%c0_64, %c0_65] : memref<1x32xf32, #tpu.memory_space<vmem>>, vector<1x32xf32>
    %114 = vector.broadcast %113 : vector<1x32xf32> to vector<8x32xf32>
    %115 = arith.addf %88, %114 : vector<8x32xf32>
    %116 = arith.mulf %98, %115 : vector<8x32xf32>
    %117 = arith.addf %112, %116 : vector<8x32xf32>
    %118 = math.tanh %117 : vector<8x32xf32>
    %cst_66 = arith.constant 1.000000e+00 : f32
    %119 = vector.broadcast %cst_66 : f32 to vector<8x32xf32>
    %120 = arith.subf %119, %108 : vector<8x32xf32>
    %121 = arith.mulf %120, %118 : vector<8x32xf32>
    %122 = arith.mulf %108, %70 : vector<8x32xf32>
    %123 = arith.addf %121, %122 : vector<8x32xf32>
    %c0_67 = arith.constant 0 : index
    %c0_68 = arith.constant 0 : index
    %124 = vector.load %arg12[%c0_67, %c0_68] : memref<8x32xf32, #tpu.memory_space<vmem>>, vector<8x32xf32>
    tpu.vector_store %arg12[%c0_67, %c0_68], %123 {strides = array<i32>} : memref<8x32xf32, #tpu.memory_space<vmem>>, vector<8x32xf32>,
    %c0_69 = arith.constant 0 : index
    %c0_70 = arith.constant 0 : index
    %125 = vector.load %arg9[%c0_69, %c0_70] : memref<32x16xf32, #tpu.memory_space<vmem>>, vector<32x16xf32>
    %cst_71 = arith.constant dense<0.000000e+00> : vector<8x16xf32>
    %126 = tpu.matmul %123, %125, %cst_71 {dimension_numbers = #tpu.dot_dimension_numbers<[1], [0], [0], [1], [0, 0, 1, 1], [], []>} : vector<8x32xf32>, vector<32x16xf32>, vector<8x16xf32> -> vector<8x16xf32>
    %c0_72 = arith.constant 0 : index
    %c0_73 = arith.constant 0 : index
    %127 = vector.load %arg10[%c0_72, %c0_73] : memref<1x16xf32, #tpu.memory_space<vmem>>, vector<1x16xf32>
    %128 = vector.broadcast %127 : vector<1x16xf32> to vector<8x16xf32>
    %129 = arith.addf %126, %128 : vector<8x16xf32>
    %cst_74 = arith.constant dense<0xFF800000> : vector<8xf32>
    %130 = vector.multi_reduction <maximumf>, %129, %cst_74 [1] : vector<8x16xf32> to vector<8xf32>
    %131 = vector.shape_cast %130 : vector<8xf32> to vector<8x1xf32>
    %132 = vector.broadcast %131 : vector<8x1xf32> to vector<8x16xf32>
    %133 = arith.subf %129, %132 : vector<8x16xf32>
    %134 = math.exp %133 : vector<8x16xf32>
    %cst_75 = arith.constant dense<0.000000e+00> : vector<8xf32>
    %135 = vector.multi_reduction <add>, %134, %cst_75 [1] : vector<8x16xf32> to vector<8xf32>
    %136 = vector.shape_cast %135 : vector<8xf32> to vector<8x1xf32>
    %137 = math.log %136 : vector<8x1xf32>
    %138 = arith.addf %137, %131 : vector<8x1xf32>
    %139 = vector.broadcast %138 : vector<8x1xf32> to vector<8x16xf32>
    %140 = arith.subf %129, %139 : vector<8x16xf32>
    %cst_76 = arith.constant 0.000000e+00 : f32
    %141 = vector.broadcast %cst_76 : f32 to vector<8x80xf32>
    %142 = tpu.concatenate %140, %123, %141 in 1 : vector<8x16xf32>, vector<8x32xf32>, vector<8x80xf32> -> vector<8x128xf32>
    %c0_77 = arith.constant 0 : index
    %c0_78 = arith.constant 0 : index
    %c0_79 = arith.constant 0 : index
    %143 = vector.load %arg11[%c0_77, %c0_78, %c0_79] : memref<1x8x128xf32, #tpu.memory_space<vmem>>, vector<1x8x128xf32>
    %144 = vector.shape_cast %143 : vector<1x8x128xf32> to vector<8x128xf32>
    %145 = vector.shape_cast %142 : vector<8x128xf32> to vector<1x8x128xf32>
    tpu.vector_store %arg11[%c0_77, %c0_78, %c0_79], %145 {strides = array<i32>} : memref<1x8x128xf32, #tpu.memory_space<vmem>>, vector<1x8x128xf32>,
    return
  }
  func.func @transform_0(%arg0: i32, %arg1: i32, %arg2: memref<8x8xi32, #tpu.memory_space<smem>>) -> (i32, i32) {
    %c0_i32 = arith.constant 0 : i32
    %c0_i32_0 = arith.constant 0 : i32
    return %arg0, %c0_i32 : i32, i32
  }
  func.func @transform_1(%arg0: i32, %arg1: i32, %arg2: memref<8x8xi32, #tpu.memory_space<smem>>) -> (i32, i32) {
    %c0_i32 = arith.constant 0 : i32
    %c0_i32_0 = arith.constant 0 : i32
    %c0_i32_1 = arith.constant 0 : i32
    return %c0_i32, %c0_i32_0 : i32, i32
  }
  func.func @transform_2(%arg0: i32, %arg1: i32, %arg2: memref<8x8xi32, #tpu.memory_space<smem>>) -> (i32, i32, i32) {
    %c0_i32 = arith.constant 0 : i32
    %c0_i32_0 = arith.constant 0 : i32
    %c0_i32_1 = arith.constant 0 : i32
    %c0_i32_2 = arith.constant 0 : i32
    return %c0_i32, %c0_i32_0, %c0_i32_1 : i32, i32, i32
  }
  func.func @transform_3(%arg0: i32, %arg1: i32, %arg2: memref<8x8xi32, #tpu.memory_space<smem>>) -> (i32, i32, i32) {
    %c0_i32 = arith.constant 0 : i32
    %c0_i32_0 = arith.constant 0 : i32
    %c0_i32_1 = arith.constant 0 : i32
    %c0_i32_2 = arith.constant 0 : i32
    return %c0_i32, %c0_i32_0, %c0_i32_1 : i32, i32, i32
  }
  func.func @transform_4(%arg0: i32, %arg1: i32, %arg2: memref<8x8xi32, #tpu.memory_space<smem>>) -> (i32, i32, i32) {
    %c0_i32 = arith.constant 0 : i32
    %c0_i32_0 = arith.constant 0 : i32
    %c0_i32_1 = arith.constant 0 : i32
    %c0_i32_2 = arith.constant 0 : i32
    return %c0_i32, %c0_i32_0, %c0_i32_1 : i32, i32, i32
  }
  func.func @transform_5(%arg0: i32, %arg1: i32, %arg2: memref<8x8xi32, #tpu.memory_space<smem>>) -> (i32, i32) {
    %c0_i32 = arith.constant 0 : i32
    %c0_i32_0 = arith.constant 0 : i32
    %c0_i32_1 = arith.constant 0 : i32
    return %c0_i32, %c0_i32_0 : i32, i32
  }
  func.func @transform_6(%arg0: i32, %arg1: i32, %arg2: memref<8x8xi32, #tpu.memory_space<smem>>) -> (i32, i32) {
    %c0_i32 = arith.constant 0 : i32
    %c0_i32_0 = arith.constant 0 : i32
    %c0_i32_1 = arith.constant 0 : i32
    return %c0_i32, %c0_i32_0 : i32, i32
  }
  func.func @transform_7(%arg0: i32, %arg1: i32, %arg2: memref<8x8xi32, #tpu.memory_space<smem>>) -> (i32, i32) {
    %c0_i32 = arith.constant 0 : i32
    %c0_i32_0 = arith.constant 0 : i32
    %c0_i32_1 = arith.constant 0 : i32
    return %c0_i32, %c0_i32_0 : i32, i32
  }
  func.func @transform_8(%arg0: i32, %arg1: i32, %arg2: memref<8x8xi32, #tpu.memory_space<smem>>) -> (i32, i32, i32) {
    %c0_i32 = arith.constant 0 : i32
    %c0_i32_0 = arith.constant 0 : i32
    return %arg1, %arg0, %c0_i32 : i32, i32, i32
  }
}

</mosaic_0001>

<bundles_post_ra>
// kernel: tpu_custom_call.1
= control target key start
LH: loop header
LB: loop body
LE: loop exit
PB: predicated region body
PF: predicated region fallthrough
CT: control target
= control target key end

     0   :  { %s2034_s0 = inlined_call_operand.vmem [shape: s32[8,8], index: 0, kind: input, shape index: {}]   ;;  %s2035_s1 = inlined_call_operand.vmem [shape: f32[8,32], index: 1, kind: input, shape index: {}]   ;;  %s2036_s2 = inlined_call_operand.vmem [shape: f32[16,32], index: 2, kind: input, shape index: {}]   ;;  %s2037_s3 = inlined_call_operand.hbm [shape: f32[3,32,32], index: 3, kind: input, shape index: {}]   ;;  %s2038_s4 = inlined_call_operand.hbm [shape: f32[3,32,32], index: 4, kind: input, shape index: {}]   ;;  %s2039_s5 = inlined_call_operand.vmem [shape: f32[3,1,32], index: 5, kind: input, shape index: {}]   ;;  %s2040_s6 = inlined_call_operand.vmem [shape: f32[1,32], index: 6, kind: input, shape index: {}]   ;;  %s2041_s7 = inlined_call_operand.vmem [shape: f32[32,16], index: 7, kind: input, shape index: {}]   ;;  %s2042_s8 = inlined_call_operand.vmem [shape: f32[1,16], index: 8, kind: input, shape index: {}]   ;;  %s2043_s9 = inlined_call_operand.hbm [shape: f32[8,8,128], index: 9, kind: output, shape index: {}]  }
   0x1   :  { %s14_s11 = sshll.u32 %s2034_s0, 4  ;;  %s15_s11 = int_to_ptr.vmem [resolvable:$true] %s14_s11 }
   0x2   :  { %s1477_s12 = scalar_lea.vmem %s15_s11, 128  ;;  %p1482_p1 = scmp.lt.s32.totalorder %s15_s11, %s15_s11 }
   0x3   :  { %p1478_p0 = scmp.ne.s32.totalorder %s15_s11, %s1477_s12  ;;  %p1483_p2 = scmp.lt.s32.totalorder %s1477_s12, %s1477_s12 }
   0x5   :  { %p1484_p3 = por %p1483_p2, %p1482_p1 }
   0x7   :  { %p1485_p4 = pnand %p1484_p3, %p1478_p0 }
   0x9   :  { %1488 = shalt.err (!%p1485_p4)  }
   0xa   :  { %s1635_s13 = smov [#allocation5]  }
   0xb   :  { %17 = dma.vmem_to_smem %s15_s11, 128, %s1635_s13, [#allocation4] }
   0xc   :  { %1597 = dma.done.wait [#allocation4], 128 }
   0xd   :  { %1598 = vsyncadd [#allocation4], 4294967168 }
   0xe   :  { %19 = sfence }
   0xf   :  { %20 = vsyncpa [#allocation7], 0 }
  0x10   :  { %21 = vsyncpa [#allocation10], 0 }
  0x11   :  { %22 = vsyncpa [#allocation8], 0 }
  0x12   :  { %24 = vsyncpa [#allocation8 + $0x1], 0  ;;  %s1698_s14 = smov 0   ;;  %s1700_s0 = smov 0  }
  0x13   :  { %s1702_s15 = smov 0   ;;  %s1704_s16 = smov 0  }
  0x14   :  { %s1706_s17 = smov 0   ;;  %s1708_s18 = smov 0  }
  0x15 LB: > { %2052 = sst [smem:[#allocation16_spill]] %s1621_s15  ;;  %s1187_s19 = sadd.s32 4294967295, %s1633_s18   ;;  %s1633_s18 = sphi %s1708_s18, %s30_s18   ;;  %s1629_s17 = sphi %s1706_s17, %s2071_s17   ;;  %s1625_s16 = sphi %s1704_s16, %s2070_s16   ;;  %s1621_s15 = sphi %s1702_s15, %s2069_s15   ;;  %s1617_s0 = sphi %s1700_s0, %s2073_s0   ;;  %s1613_s14 = sphi %s1698_s14, %s2072_s14  }
  0x16   : > { %2053 = sst [smem:[#allocation17_spill]] %s1629_s17  ;;  %s1188_s20 = sadd.s32 4294967294, %s1633_s18  }
  0x17   : > { %s39_s21 = sadd.s32 1, %s1629_s17  ;;  %s224_s22 = sadd.s32 1, %s1621_s15 }
  0x18   : > { %p40_p5 = scmp.ge.s32.totalorder %s39_s21, 8  ;;  %p234_p6 = scmp.ne.s32.totalorder %s1621_s15, %s1617_s0 }
  0x19   : > { %p235_p7 = scmp.eq.s32.totalorder %s1187_s19, 7  ;;  %p240_p8 = scmp.ne.s32.totalorder %s1617_s0, %s1613_s14 }
  0x1a   : > { %s2075_s21 = smov (%p40_p5, %s39_s21), 0  ;;  %p241_p10 = scmp.eq.s32.totalorder %s1188_s20, 7 }
  0x1b   : > { %2054 = sst [smem:[#allocation18_spill]] %s2075_s21  ;;  %p1738_p9 = por %p235_p7, %p234_p6 }
  0x1c   : > { %s219_s24 = ssub.s32 %s1629_s17, %s2075_s21  ;;  %p1189_p11 = scmp.ge.s32.totalorder %s1633_s18, 1 }
  0x1d   : > { %s2055_s23 = scalar_select %p1738_p9, 1, 0 }
  0x1e   : > { %p222_p12 = scmp.eq.s32.totalorder %s219_s24, 0  ;;  %p1745_p13 = por %p241_p10, %p240_p8 }
  0x1f   : > { %p248_p0 = scmp.lt.s32.totalorder %s1633_s18, 9  ;;  %p1757_p2 = scmp.eq.s32.totalorder %s1187_s19, 0 }
  0x20   : > { %s2056_s25 = scalar_select %p1745_p13, 1, 0 }
  0x21   : > { %s1751_s26 = scalar_select %p222_p12, %s1621_s15, %s224_s22  }
  0x22   : > { %p1753_p1 = pnand %p1189_p11, %p248_p0  ;;  %s1636_s29 = smov [#allocation6]  }
  0x23   : > { %2057 = sst [smem:[#allocation19_spill]] %s1751_s26  ;;  %s270_s30 = sshll.u32 %s1636_s29, 4  ;;  %s271_s30 = int_to_ptr.vmem [resolvable:$true] %s270_s30 }
  0x24   : > { %s2058_s27 = scalar_select %p1753_p1, 1, 0 }
  0x25   : > { %s2059_s28 = scalar_select %p1757_p2, 1, 0 }
  0x26   : > { %p1390_p3 = pneg %p1753_p1  ;;  %s1637_s11 = smov [#allocation9]  }
  0x27   : > { %s283_s12 = sshll.u32 %s1637_s11, 4  ;;  %s1489_s20 = scalar_lea.hbm %s2037_s3, 1536  ;;  %s1769_s12 = int_to_ptr.vmem [resolvable:$true] %s283_s12 }
  0x28   : > { %p1765_p4 = pnand %p1757_p2, %p1390_p3  ;;  %p1490_p5 = scmp.ne.s32.totalorder %s2037_s3, %s1489_s20 }
  0x29   : > { %p1496_p10 = scmp.lt.u32.totalorder %s1489_s20, %s2037_s3 }
  0x2a   : > { %p1491_p6 = pneg %p1765_p4 }
  0x2c   : > { %p1492_p7 = pnand %p1491_p6, %p1490_p5 }
  0x2e   : > { %p1493_p8 = pneg %p1492_p7 }
  0x30   : > { %p1498_p11 = pnand %p1496_p10, %p1493_p8 }
  0x32   : > { %1501 = shalt.err (!%p1498_p11)
}
  0x33   : > { %s1502_s11 = scalar_lea.vmem %s271_s30, 1536  ;;  %p1510_p13 = scmp.lt.s32.totalorder %s271_s30, %s271_s30 }
  0x34   : > { %p1503_p12 = scmp.ne.s32.totalorder %s271_s30, %s1502_s11  ;;  %p1511_p9 = scmp.lt.s32.totalorder %s1502_s11, %s1502_s11 }
  0x36   : > { %p1505_p0 = pnand %p1503_p12, %p1491_p6  ;;  %p1512_p2 = por %p1511_p9, %p1510_p13 }
  0x38   : > { %p1506_p3 = pneg %p1505_p0 }
  0x3a   : > { %p1513_p1 = pnand %p1512_p2, %p1506_p3 }
  0x3c   : > { %1516 = shalt.err (!%p1513_p1)
}
  0x3d   : > { %s1638_s13 = smov 128   ;;  %s1639_s19 = smov 8  }
  0x3e   : > { %1393 = dma.hbm_to_vmem [thread:$0]  (!%p1765_p4), %s2037_s3, 1536, %s271_s30, [#allocation7], %s1638_s13, %s1638_s13, %s1639_s19  }
  0x3f   : > { %s1517_s29 = scalar_lea.hbm %s2038_s4, 1536 }
  0x40   : > { %p1518_p5 = scmp.ne.s32.totalorder %s2038_s4, %s1517_s29  ;;  %p1524_p1 = scmp.lt.u32.totalorder %s1517_s29, %s2038_s4 }
  0x42   : > { %p1520_p9 = pnand %p1518_p5, %p1491_p6 }
  0x44   : > { %p1521_p13 = pneg %p1520_p9 }
  0x46   : > { %p1526_p2 = pnand %p1524_p1, %p1521_p13 }
  0x48   : > { %1529 = shalt.err (!%p1526_p2)
}
  0x49   : > { %s1530_s30 = scalar_lea.vmem %s1769_s12, 1536  ;;  %p1538_p11 = scmp.lt.s32.totalorder %s1769_s12, %s1769_s12 }
  0x4a   : > { %p1531_p7 = scmp.ne.s32.totalorder %s1769_s12, %s1530_s30  ;;  %p1539_p12 = scmp.lt.s32.totalorder %s1530_s30, %s1530_s30 }
  0x4c   : > { %p1533_p8 = pnand %p1531_p7, %p1491_p6  ;;  %p1540_p0 = por %p1539_p12, %p1538_p11 }
  0x4e   : > { %p1534_p10 = pneg %p1533_p8 }
  0x50   : > { %p1541_p3 = pnand %p1540_p0, %p1534_p10 }
  0x52   : > { %1544 = shalt.err (!%p1541_p3)
}
  0x53   : > { %1396 = dma.hbm_to_vmem [thread:$0]  (!%p1765_p4), %s2038_s4, 1536, %s1769_s12, [#allocation10], %s1638_s13, %s1638_s13, %s1639_s19  }
  0x54   : > { %p2061_p5 = scmp.ne.s32.totalorder %s2058_s27, 0 }
  0x55   : > { %p2062_p9 = scmp.ne.s32.totalorder (!%p2061_p5), %s2059_s28, 0 }
  0x56   : > { %311 = sbr.rel (%p2061_p5) target bundleno = 941 (0x3ad), region = 52 }
  0x5d   : > { %1600 = dma.done.wait (%p2062_p9), [#allocation7], 1536  }
  0x5e   : > { %1602 = vsyncadd (%p2062_p9), [#allocation7], 4294965760 }
  0x5f   : > { %1604 = dma.done.wait (%p2062_p9), [#allocation10], 1536  }
  0x60   : > { %1606 = vsyncadd (%p2062_p9), [#allocation10], 4294965760  ;;  %s2051_s26 = sand.u32 1, %s1617_s0   ;;  %p1197_p4 = scmp.ne.s32.totalorder %s1625_s16, 0 }
  0x61   : > { %s1831_s10 = sshll.u32 %s2051_s26, 3  ;;  %v356_v0 = vld [vmem:[%s2035_s1] sm:$0xff] (!%p1197_p4)  ;;  %vm357_vm0 = vcmask (!%p1197_p4), 261120  }
  0x62   : > { %355 = sbr.rel (%p1197_p4) target bundleno = 105 (0x69), region = 64  ;;  %358 = vst.msk [vmem:[#allocation2] sm:$0xff] (!%p1197_p4), %vm357_vm0, %v356_v0 }
  0x69 PF: > { %v473_v1 = vld [vmem:[#allocation9] sm:$0xff]  ;;  %v474_v2 = vld [vmem:[#allocation9 + $0x8] sm:$0xff]  ;;  %v475_v3 = vld [vmem:[#allocation9 + $0x10] sm:$0xff]  ;;  %v1640_v4 = vmov 0.0|0.0   ;;  %s1841_s28 = sshll.u32 %s1625_s16, 7  ;;  %vm1641_vm1 = vmmov 0  }
  0x6a   : > { %1338 = vmatprep.subr.bf16.mxu0 %v1640_v4  ;;  %v1339_v5 = vpack.c.bf16 %v474_v2, %v473_v1  ;;  %v476_v6 = vld [vmem:[#allocation9 + $0x18] sm:$0xff]  ;;  %1344 = vmatprep.subr.bf16.mxu1 %v1640_v4  ;;  %v552_v7 = vld [vmem:[#allocation9 + $0x20] sm:$0xff]  ;;  %v553_v8 = vld [vmem:[#allocation9 + $0x28] sm:$0xff]  ;;  %v1642_v9 = vmov 0.0   ;;  %s1848_s19 = sld [smem:[#allocation5 + %s1841_s28]]  ;;  %s379_s21 = sadd.s32 1, %s1841_s28 }
  0x6b   : > { %1269 = vmatprep.mubr.msk.f32.mxu0 %vm1641_vm1, %v1642_v9  ;;  %v1345_v10 = vpack.c.bf16 %v553_v8, %v552_v7  ;;  %1280 = vmatprep.mubr.msk.f32.mxu1 %vm1641_vm1, %v1642_v9  ;;  %v1342_v11 = vpack.c.bf16 %v476_v6, %v475_v3  ;;  %v554_v12 = vld [vmem:[#allocation9 + $0x30] sm:$0xff]  ;;  %v555_v13 = vld [vmem:[#allocation9 + $0x38] sm:$0xff]  ;;  %s1851_s16 = sld [smem:[#allocation5 + %s379_s21]]  ;;  %s391_s20 = sadd.s32 2, %s1841_s28  ;;  %v459_v14 = vld [vmem:[#allocation6] sm:$0xff]  ;;  %vm477_vm2 = vcmask 261120  }
  0x6c   : > { %1340 = vmatpush3.bf16.msra.mxu0 %v1339_v5  ;;  %v460_v15 = vld [vmem:[#allocation6 + $0x8] sm:$0xff]  ;;  %v1348_v16 = vpack.c.bf16 %v555_v13, %v554_v12  ;;  %s1855_s22 = sld [smem:[#allocation5 + %s391_s20]]  ;;  %s403_s24 = sadd.s32 3, %s1841_s28  ;;  %v464_v17 = vld [vmem:[#allocation6 + $0x20] sm:$0xff]  ;;  %v1865_v19 = vld [vmem:[#allocation2] sm:$0xff]  ;;  %vm370_vm3 = vcmask 253952  }
  0x6d   : > { %1341 = vmatprep.subr.bf16.mxu0 %v1640_v4  ;;  %1346 = vmatpush3.bf16.msra.mxu1 %v1345_v10  ;;  %s1859_s29 = sld [smem:[#allocation5 + %s403_s24]]  ;;  %s415_s11 = sadd.s32 4, %s1841_s28  ;;  %v465_v18 = vld [vmem:[#allocation6 + $0x28] sm:$0xff]  ;;  %v1351_v20 = vpack.c.bf16 %v460_v15, %v459_v14  ;;  %v461_v21 = vld [vmem:[#allocation6 + $0x10] sm:$0xff]  ;;  %v462_v22 = vld [vmem:[#allocation6 + $0x18] sm:$0xff]  ;;  %vm1050_vm4 = vcmask 130048  }
  0x6e   : > { %1347 = vmatprep.subr.bf16.mxu1 %v1640_v4  ;;  %s1862_s30 = sld [smem:[#allocation5 + %s415_s11]]  ;;  %s427_s15 = sadd.s32 5, %s1841_s28  ;;  %v1357_v23 = vpack.c.bf16 %v465_v18, %v464_v17  ;;  %v466_v26 = vld [vmem:[#allocation6 + $0x30] sm:$0xff]  ;;  %v467_v27 = vld [vmem:[#allocation6 + $0x38] sm:$0xff]  ;;  %v1354_v28 = vpack.c.bf16 %v462_v22, %v461_v21  ;;  %v627_v36 = vld [vmem:[#allocation9 + $0x40] sm:$0xff]  ;;  %vm1068_vm5 = vcmask 392192  }
  0x6f   : > { %s1867_s17 = sld [smem:[#allocation5 + %s427_s15]]  ;;  %s439_s12 = sadd.s32 6, %s1841_s28  ;;  %v1360_v32 = vpack.c.bf16 %v467_v27, %v466_v26  ;;  %v628_v37 = vld [vmem:[#allocation9 + $0x48] sm:$0xff]  ;;  %v469_v38 = vld [vmem:[#allocation6 + $0x40] sm:$0xff]  ;;  %v629_v43 = vld [vmem:[#allocation9 + $0x50] sm:$0xff] }
  0x70   : > { %1343 = vmatpush3.bf16.msra.mxu0 %v1342_v11  ;;  %s368_s20 = scalar_lea.vmem %s2036_s2, %s1848_s19  ;;  %s1875_s24 = sld [smem:[#allocation5 + %s439_s12]]  ;;  %v470_v39 = vld [vmem:[#allocation6 + $0x48] sm:$0xff]  ;;  %v1369_v41 = vpack.c.bf16 %v628_v37, %v627_v36  ;;  %v630_v45 = vld [vmem:[#allocation9 + $0x58] sm:$0xff]  ;;  %v471_v46 = vld [vmem:[#allocation6 + $0x50] sm:$0xff] }
  0x71   : > { %1350 = vmatprep.subr.bf16.mxu0 %v1640_v4  ;;  %1349 = vmatpush3.bf16.msra.mxu1 %v1348_v16  ;;  %v369_v24 = vld [vmem:[%s368_s20] sm:$0x1]  ;;  %s381_s26 = scalar_lea.vmem %s2036_s2, %s1851_s16  ;;  %s451_s27 = sadd.s32 7, %s1841_s28  ;;  %v1363_v42 = vpack.c.bf16 %v470_v39, %v469_v38  ;;  %v472_v47 = vld [vmem:[#allocation6 + $0x58] sm:$0xff]  ;;  %v1372_v48 = vpack.c.bf16 %v630_v45, %v629_v43  ;;  %v968_v52 = vld [vmem:[%s2041_s7 + $0x10] sm:$0xff] }
  0x72   : > { %1356 = vmatprep.subr.bf16.mxu1 %v1640_v4  ;;  %371 = vst.msk [vmem:[#allocation3] sm:$0x1] %vm370_vm3, %v369_v24  ;;  %v382_v25 = vld [vmem:[%s381_s26] sm:$0x1]  ;;  %s393_s13 = scalar_lea.vmem %s2036_s2, %s1855_s22  ;;  %s1890_s21 = sld [smem:[#allocation5 + %s451_s27]]  ;;  %v1366_v49 = vpack.c.bf16 %v472_v47, %v471_v46  ;;  %v967_v51 = vld [vmem:[%s2041_s7 + $0x8] sm:$0xff] }
  0x73   : > { %1270 = vmatmul.mubr.msk.f32.vlgmr.msra.gmra.mrb[0].mxu0 %vm477_vm2, %v1865_v19  ;;  %383 = vst.msk [vmem:[#allocation3 + $0x1] sm:$0x1] %vm370_vm3, %v382_v25  ;;  %v394_v29 = vld [vmem:[%s393_s13] sm:$0x1]  ;;  %s405_s20 = scalar_lea.vmem %s2036_s2, %s1859_s29  ;;  %v969_v54 = vld [vmem:[%s2041_s7 + $0x18] sm:$0xff]  ;;  %s2063_s22 = scalar_lea.vmem [#allocation11], %s1831_s10 }
  0x74   : > { %1352 = vmatpush3.bf16.msra.mxu0 %v1351_v20  ;;  %1281 = vmatmul.mubr.msk.f32.vlgmr.msra.gmra.mrb[0].mxu1 %vm477_vm2, %v1865_v19  ;;  %395 = vst.msk [vmem:[#allocation3 + $0x2] sm:$0x1] %vm370_vm3, %v394_v29  ;;  %v406_v30 = vld [vmem:[%s405_s20] sm:$0x1]  ;;  %s417_s11 = scalar_lea.vmem %s2036_s2, %s1862_s30  ;;  %v1378_v55 = vpack.c.bf16 %v969_v54, %v968_v52  ;;  %v1216_v16 = vld [vmem:[%s2039_s5 + $0x2] ss:$0 sm:$0xff]  ;;  %s2064_s12 = smov %s2063_s22 }
  0x75   : > { %1353 = vmatprep.subr.bf16.mxu0 %v1640_v4  ;;  %1291 = vmatprep.mubr.msk.f32.mxu0 %vm1641_vm1, %v1642_v9  ;;  %407 = vst.msk [vmem:[#allocation3 + $0x3] sm:$0x1] %vm370_vm3, %v406_v30  ;;  %v418_v31 = vld [vmem:[%s417_s11] sm:$0x1]  ;;  %s429_s29 = scalar_lea.vmem %s2036_s2, %s1867_s17  ;;  %s1086_s11 = sshll.u32 %s2063_s22, 4  ;;  %s1985_s11 = int_to_ptr.vmem [resolvable:$true] %s1086_s11 }
  0x76   : > { %1358 = vmatpush3.bf16.msra.mxu1 %v1357_v23  ;;  %1302 = vmatprep.mubr.msk.f32.mxu1 %vm1641_vm1, %v1642_v9  ;;  %419 = vst.msk [vmem:[#allocation3 + $0x4] sm:$0x1] %vm370_vm3, %v418_v31  ;;  %v430_v33 = vld [vmem:[%s429_s29] sm:$0x1]  ;;  %s441_s16 = scalar_lea.vmem %s2036_s2, %s1875_s24  ;;  %s1983_s29 = scalar_lea.hbm %s2043_s9, %s1841_s28 }
  0x77   : > { %1359 = vmatprep.subr.bf16.mxu1 %v1640_v4  ;;  %431 = vst.msk [vmem:[#allocation3 + $0x5] sm:$0x1] %vm370_vm3, %v430_v33  ;;  %v442_v34 = vld [vmem:[%s441_s16] sm:$0x1]  ;;  %s2065_s13 = sand.u32 1, %s1617_s0   ;;  %s1545_s30 = scalar_lea.vmem %s1985_s11, 128 }
  0x78   : > { %1355 = vmatpush3.bf16.msra.mxu0 %v1354_v28  ;;  %443 = vst.msk [vmem:[#allocation3 + $0x6] sm:$0x1] %vm370_vm3, %v442_v34  ;;  %s453_s26 = scalar_lea.vmem %s2036_s2, %s1890_s21  ;;  %v966_v50 = vld [vmem:[%s2041_s7] sm:$0xff]  ;;  %s1643_s21 = smov 16  }
  0x79   : > { %1362 = vmatprep.subr.bf16.mxu0 %v1640_v4  ;;  %v454_v35 = vld [vmem:[%s453_s26] sm:$0x1]  ;;  %v1375_v53 = vpack.c.bf16 %v967_v51, %v966_v50  ;;  %s1072_s16 = scalar_lea.sflag [#allocation8], %s2065_s13  ;;  %p1546_p6 = scmp.ne.s32.totalorder %s1985_s11, %s1545_s30 }
  0x7a   : > { %1361 = vmatpush3.bf16.msra.mxu1 %v1360_v32  ;;  %455 = vst.msk [vmem:[#allocation3 + $0x7] sm:$0x1] %vm370_vm3, %v454_v35  ;;  %v1209_v61 = vld [vmem:[%s2039_s5] ss:$0 sm:$0xff]  ;;  %p2066_p13 = scmp.ne.s32.totalorder %s2055_s23, 0  ;;  %s1644_s17 = smov [#allocation11]  }
  0x7b   : > { %1368 = vmatprep.subr.bf16.mxu1 %v1640_v4  ;;  %v1218_v15 = vld [vmem:[%s2040_s6] ss:$0 sm:$0xff]  ;;  %s1549_s26 = sshll.u32 %s1644_s17, 4  ;;  %s1550_s26 = int_to_ptr.vmem [resolvable:$false] %s1549_s26 }
  0x7c   : > { %v1220_v30 = vld [vmem:[%s2042_s8] ss:$0 sm:$0xff]  ;;  %p1547_p1 = pnand %p1546_p6, %p2066_p13  ;;  %s1551_s28 = scalar_lea.vmem %s1550_s26, 256 }
  0x7d   : > { %p1552_p7 = scmp.lt.s32.totalorder %s1985_s11, %s1550_s26  ;;  %p1553_p8 = scmp.lt.s32.totalorder %s1551_s28, %s1545_s30 }
  0x7e   : > { %p1548_p2 = pneg %p1547_p1 }
  0x7f   : > { %p1554_p10 = por %p1553_p8, %p1552_p7 }
  0x81   : > { %v456_v40 = vld [vmem:[#allocation3] sm:$0xff]  ;;  %p1555_p11 = pnand %p1554_p10, %p1548_p2 }
  0x82   : > { %v457_v44 = vmax.f32 %v456_v40, 0.0 }
  0x84   : > { %1292 = vmatmul.mubr.msk.f32.vlgmr.msra.gmra.mrb[2].mxu0 %vm477_vm2, %v457_v44  ;;  %1303 = vmatmul.mubr.msk.f32.vlgmr.msra.gmra.mrb[2].mxu1 %vm477_vm2, %v457_v44 }
  0x85   : > { %1370 = vmatpush3.bf16.msra.mxu1 %v1369_v41  ;;  %1364 = vmatpush3.bf16.msra.mxu0 %v1363_v42 }
  0x86   : > { %1371 = vmatprep.subr.bf16.mxu1 %v1640_v4  ;;  %1365 = vmatprep.subr.bf16.mxu0 %v1640_v4 }
  0x87   : > { %1324 = vmatprep.mubr.msk.f32.mxu1 %vm1641_vm1, %v1642_v9  ;;  %1313 = vmatprep.mubr.msk.f32.mxu0 %vm1641_vm1, %v1642_v9 }
  0x89   : > { %1373 = vmatpush3.bf16.msra.mxu1 %v1372_v48  ;;  %1367 = vmatpush3.bf16.msra.mxu0 %v1366_v49 }
  0x8a   : > { %1374 = vmatprep.subr.bf16.mxu0 %v1640_v4 }
  0x8c   : > { %1325 = vmatmul.mubr.msk.f32.vlgmr.msra.gmra.mrb[4].mxu1 %vm477_vm2, %v1865_v19  ;;  %1314 = vmatmul.mubr.msk.f32.vlgmr.msra.gmra.mrb[4].mxu0 %vm477_vm2, %v457_v44 }
  0x8d   : > { %1335 = vmatprep.mubr.msk.f32.mxu0 %vm1641_vm1, %v1642_v9  ;;  %1376 = vmatpush3.bf16.msra.mxu0 %v1375_v53 }
  0x8e   : > { %1377 = vmatprep.subr.bf16.mxu0 %v1640_v4  ;;  %v1213_v4 = vld [vmem:[%s2039_s5 + $0x1] ss:$0 sm:$0xff] }
  0x91   : > { %1379 = vmatpush3.bf16.msra.mxu0 %v1378_v55 }
 0x146   : > { %v547_v56 = vpop.f32.mrb[0].mxu0 }
 0x147   : > { %v1271_v57 = vpop.f32.mrb[1].mxu0  ;;  %v622_v58 = vpop.f32.mrb[0].mxu1 }
 0x148   : > { %v1282_v59 = vpop.f32.mrb[1].mxu1 }
 0x157   : > { %v700_v60 = vpop.f32.mrb[2].mxu0  ;;  %v784_v62 = vpop.f32.mrb[2].mxu1 }
 0x158   : > { %v701_v63 = vadd.f32 %v700_v60, %v547_v56  ;;  %v1293_v0 = vpop.f32.mrb[3].mxu0  ;;  %v785_v1 = vadd.f32 %v784_v62, %v622_v58  ;;  %v1304_v2 = vpop.f32.mrb[3].mxu1 }
 0x15a   : > { %v711_v3 = vadd.f32 %v1209_v61, %v701_v63  ;;  %v796_v6 = vadd.f32 %v1213_v4, %v785_v1 }
 0x15c   : > { %v1210_v5 = vmul.f32 -1.442695, %v711_v3  ;;  %v1214_v11 = vmul.f32 -1.442695, %v796_v6 }
 0x15e   : > { %1463 = vpow2.f32 %v1210_v5 }
 0x15f   : > { %v954_v7 = vpop.f32.mrb[4].mxu1  ;;  %v877_v8 = vpop.f32.mrb[4].mxu0  ;;  %1465 = vpow2.f32 %v1214_v11 }
 0x160   : > { %v1326_v9 = vpop.f32.mrb[5].mxu1  ;;  %v1315_v10 = vpop.f32.mrb[5].mxu0  ;;  %v955_v18 = vadd.f32 %v1218_v15, %v954_v7  ;;  %v878_v20 = vadd.f32 %v1216_v16, %v877_v8 }
 0x168   : > { %v1464_v12 = vpop.eup %1463 }
 0x169   : > { %v715_v13 = vadd.f32 1.0, %v1464_v12  ;;  %v1466_v14 = vpop.eup %1465 }
 0x16a   : > { %v800_v17 = vadd.f32 1.0, %v1466_v14 }
 0x16b   : > { %1467 = vrcp.f32 %v715_v13 }
 0x16c   : > { %1469 = vrcp.f32 %v800_v17 }
 0x175   : > { %v1468_v21 = vpop.eup %1467 }
 0x176   : > { %v958_v22 = vmul.f32 %v1468_v21, %v955_v18  ;;  %v1470_v24 = vpop.eup %1469 }
 0x177   : > { %v961_v25 = vsub.f32 1.0, %v1470_v24  ;;  %v963_v28 = vmul.f32 %v1470_v24, %v1865_v19 }
 0x178   : > { %v959_v23 = vadd.f32 %v958_v22, %v878_v20 }
 0x17a   : > { %1471 = vtanh.f32 %v959_v23 }
 0x184   : > { %v1472_v26 = vpop.eup %1471 }
 0x185   : > { %v962_v27 = vmul.f32 %v1472_v26, %v961_v25 }
 0x187   : > { %v964_v29 = vadd.f32 %v963_v28, %v962_v27 }
 0x189   : > { %1064 = vrot.lane.b32.xlu1 %v964_v29, %s1643_s21  ;;  %965 = vst.msk [vmem:[#allocation2] sm:$0xff] %vm477_vm2, %v964_v29  ;;  %1336 = vmatmul.mubr.msk.f32.vlgmr.msra.gmra.mrb[6].mxu0 %vm477_vm2, %v964_v29 }
 0x1fb   : > { %v1065_v44 = vpop.permute.xlu1 %1064 }
 0x25c   : > { %v1046_v31 = vpop.f32.mrb[6].mxu0 }
 0x25d   : > { %v1047_v32 = vadd.f32 %v1220_v30, %v1046_v31  ;;  %v1337_v33 = vpop.f32.mrb[7].mxu0 }
 0x25f   : > { %v1051_v34 = vsel %vm1050_vm4, %v1047_v32, -inf }
 0x260   : > { %1052 = vmax.xlane.f32.xlu0 %v1051_v34 }
 0x2ed   : > { %v1053_v19 = vpop.xlane.xlu0 %1052 }
 0x2ee   : > { %v1054_v35 = vsub.f32 %v1047_v32, %v1053_v19 }
 0x2f0   : > { %v1055_v36 = vmul.f32 1.442695, %v1054_v35 }
 0x2f2   : > { %1473 = vpow2.f32 %v1055_v36 }
 0x2fc   : > { %v1474_v37 = vpop.eup %1473 }
 0x2fd   : > { %v1057_v38 = vsel %vm1050_vm4, %v1474_v37, 0.0 }
 0x2fe   : > { %1058 = vadd.xlane.f32.xlu0 %v1057_v38 }
 0x38b   : > { %v1059_v39 = vpop.xlane.xlu0 %1058 }
 0x38c   : > { %1475 = vlog2.f32 %v1059_v39 }
 0x396   : > { %v1476_v40 = vpop.eup %1475 }
 0x397   : > { %v1061_v41 = vmul.f32 0.6931472, %v1476_v40 }
 0x399   : > { %v1062_v42 = vadd.f32 %v1061_v41, %v1053_v19 }
 0x39b   : > { %v1063_v43 = vsub.f32 %v1047_v32, %v1062_v42 }
 0x39d   : > { %v1067_v45 = vsel %vm1050_vm4, %v1063_v43, %v1065_v44 }
 0x39e   : > { %v1069_v46 = vsel %vm1068_vm5, %v1067_v45, 0.0 }
 0x39f   : > { %1070 = vst [vmem:[%s2064_s12] sm:$0xff] %v1069_v46 }
 0x3a0   : > { %1558 = shalt.err (!%p1555_p11)
}
 0x3a1   : > { %s1559_s10 = scalar_lea.hbm %s1983_s29, 128  ;;  %s1563_s20 = scalar_lea.hbm %s2043_s9, 1024 }
 0x3a2   : > { %p1560_p12 = scmp.ne.s32.totalorder %s1983_s29, %s1559_s10  ;;  %p1564_p5 = scmp.lt.u32.totalorder %s1983_s29, %s2043_s9 }
 0x3a3   : > { %p1565_p9 = scmp.lt.u32.totalorder %s1563_s20, %s1559_s10  ;;  %p1567_p6 = scmp.lt.u32.totalorder %s1559_s10, %s1983_s29 }
 0x3a4   : > { %p1561_p0 = pnand %p1560_p12, %p2066_p13 }
 0x3a5   : > { %p1566_p4 = por %p1565_p9, %p1564_p5 }
 0x3a6   : > { %p1562_p3 = pneg %p1561_p0 }
 0x3a7   : > { %p1568_p1 = por %p1567_p6, %p1566_p4 }
 0x3a9   : > { %p1569_p2 = pnand %p1568_p1, %p1562_p3 }
 0x3ab   : > { %1572 = shalt.err (!%p1569_p2)
}
 0x3ac   : > { %1388 = dma.vmem_to_hbm [thread:$0]  (%p2066_p13), %s1985_s11, 128, %s1983_s29, %s1072_s16  }
 0x3ad PF: > { %p1405_p7 = scmp.ge.s32.totalorder %s1633_s18, 2  ;;  %s1098_s15 = sand.u32 1, %s1613_s14  }
 0x3ae   : > { %p2067_p8 = scmp.ne.s32.totalorder %s2056_s25, 0  ;;  %s1099_s19 = scalar_lea.sflag [#allocation8], %s1098_s15 }
 0x3b0   : > { %p1398_p10 = pnand %p1405_p7, %p2067_p8 }
 0x3b2   : > { %1608 = dma.done.wait (!%p1398_p10), %s1099_s19, 128  }
 0x3b3   : > { %1610 = vsyncadd (!%p1398_p10), %s1099_s19, 4294967168  ;;  %s30_s18 = sadd.s32 1, %s1633_s18   ;;  %s2068_s12 = sld [smem:[#allocation16_spill]] }
 0x3b4   : > { %p27_p11 = scmp.ge.s32.totalorder %s30_s18, 10   ;;  %s2069_s15 = sld [smem:[#allocation19_spill]] }
 0x3b5   : > { %s2070_s16 = sld [smem:[#allocation17_spill]]  ;;  %s2071_s17 = sld [smem:[#allocation18_spill]] }
 0x3b6   : > { %s2072_s14 = smov %s1617_s0  ;;  %29 = sbr.rel (!%p27_p11) target bundleno = 21 (0x15), region = 114 }
 0x3b9   : > { %s2073_s0 = smov %s2068_s12 }
 0x3bd   :  { %1104 = vsyncpa [#allocation7], 1 }
 0x3be   :  { %1106 = vsyncpa [#allocation7 + $0x1], 1 }
 0x3bf   :  { %1107 = vsyncpa [#allocation10], 1 }
 0x3c0   :  { %1108 = vsyncpa [#allocation8], 1 }
 0x3c1   :  { %1110 = vsyncpa [#allocation8 + $0x1], 1 }

</bundles_post_ra>
